<compile_context>
chip_gen: v7x
topology: tpu7x:2x2x1
jax: 0.10.0
libtpu: 0.0.40
codegen_flags: <defaults>
</compile_context>

<pallas_src>
import functools

import jax
import jax.numpy as jnp
from jax.experimental import pallas as pl
from jax.experimental.pallas import tpu as pltpu

_EPS = 1e-5
_DEFAULT_BLOCK_ELEMS = 1 << 20          # ~4 MiB of f32 per streamed block
_VMEM_LIMIT_BYTES = 48 * 1024 * 1024    # > default scoped 16/32 MiB, < 64 MiB/TC (v7x)


def _round_up(x, m):
    return ((x + m - 1) // m) * m


def _sublane(dtype):
    # minimum second-minor tile per dtype (f32: 8, bf16: 16, int8/fp8: 32)
    return {4: 8, 2: 16, 1: 32}.get(jnp.dtype(dtype).itemsize, 8)


# --------------------------------------------------------------------------
# Path A: full spatial extent resident per block  (typical AdaIN feature maps)
# --------------------------------------------------------------------------
def _adain_resident_kernel(gamma_ref, beta_ref, x_ref, out_ref, *, inv_hw):
    # gamma_ref/beta_ref : (Rt, 1) f32 ; x_ref/out_ref : (Rt, HW) native dtype
    x = x_ref[...]
    xf = x.astype(jnp.float32)

    # Exact two-pass statistics (data is resident in VMEM, second pass is free
    # relative to the HBM stream).
    mean = jnp.sum(xf, axis=-1, keepdims=True) * inv_hw          # (Rt, 1)
    centered = xf - mean
    var = jnp.sum(centered * centered, axis=-1, keepdims=True) * inv_hw
    rstd = jax.lax.rsqrt(var + _EPS)
    scale = gamma_ref[...] * rstd                                # (Rt, 1)

    if out_ref.dtype == jnp.float32:
        # f32: keep the numerically exact centered form.
        out_ref[...] = centered * scale + beta_ref[...]
    else:
        # bf16/fp8: only the reductions above run in f32; the writeback is a
        # fused x*scale + shift in the native dtype (v6e/v7x VPU has bf16),
        # avoiding another full-block f32 temp.
        shift = beta_ref[...] - mean * scale
        out_ref[...] = (x * scale.astype(x.dtype) +
                        shift.astype(x.dtype)).astype(out_ref.dtype)


# --------------------------------------------------------------------------
# Path B: chunked-HW fallback for very large spatial extents.
# grid = (row_tiles, pass, hw_chunks); pass 0 accumulates shifted one-pass
# stats into VMEM scratch, pass 1 streams the normalized output.
# --------------------------------------------------------------------------
def _adain_chunked_kernel(gamma_ref, beta_ref, x_ref, out_ref,
                          pivot_ref, s1_ref, s2_ref, scale_ref, shift_ref,
                          *, hw, hw_chunk):
    p = pl.program_id(1)        # 0 = stats pass, 1 = write pass
    h = pl.program_id(2)        # hw-chunk index

    xf = x_ref[...].astype(jnp.float32)
    # Lane mask for the (possibly partial) last chunk — without the wrapper
    # pad, out-of-range lanes hold garbage and must not enter the stats.
    lane = jax.lax.broadcasted_iota(jnp.int32, x_ref.shape, 1)
    valid = (h * hw_chunk + lane) < hw

    @pl.when(jnp.logical_and(p == 0, h == 0))
    def _init():
        # Per-row pivot (first element): a shifted one-pass variance is
        # shift-invariant, which removes most of the E[x^2]-mean^2
        # cancellation while still needing only one stats pass per chunk.
        pivot_ref[...] = xf[:, :1]
        s1_ref[...] = jnp.zeros_like(s1_ref)
        s2_ref[...] = jnp.zeros_like(s2_ref)

    @pl.when(p == 0)
    def _accumulate():
        d = jnp.where(valid, xf - pivot_ref[...], 0.0)
        s1_ref[...] += jnp.sum(d, axis=-1, keepdims=True)
        s2_ref[...] += jnp.sum(d * d, axis=-1, keepdims=True)

    @pl.when(jnp.logical_and(p == 1, h == 0))
    def _finalize_stats():
        inv_hw = 1.0 / hw
        mean_d = s1_ref[...] * inv_hw
        var = jnp.maximum(s2_ref[...] * inv_hw - mean_d * mean_d, 0.0)
        rstd = jax.lax.rsqrt(var + _EPS)
        mean = pivot_ref[...] + mean_d
        scale_ref[...] = gamma_ref[...] * rstd
        shift_ref[...] = beta_ref[...] - mean * scale_ref[...]

    @pl.when(p == 1)
    def _write():
        # Out-of-range lanes of a partial last chunk are dropped on writeback.
        out_ref[...] = (xf * scale_ref[...] + shift_ref[...]).astype(out_ref.dtype)


# --------------------------------------------------------------------------
# Wrapper
# --------------------------------------------------------------------------
def adaptive_instance_norm(x_nchw, style, weight, bias, *,
                           block_elems=_DEFAULT_BLOCK_ELEMS,
                           force_chunked=False, hw_chunk=None):
    """x_nchw: (N, C, H, W); style: (N, style_dim);
    weight: (2*fin, style_dim) as in nn.Linear; bias: (2*fin,)."""
    N, C, H, W = x_nchw.shape
    HW = H * W
    rows = N * C
    dtype = x_nchw.dtype
    sub = _sublane(dtype)

    # --- style affine hoisted out of the kernel (one tiny XLA matmul) ---
    aff = (style.astype(jnp.float32) @ weight.astype(jnp.float32).T
           + bias.astype(jnp.float32))                       # (N, 2C)
    gamma = aff[:, :C].reshape(rows, 1)                      # (N*C, 1) f32
    beta = aff[:, C:].reshape(rows, 1)

    # --- (N*C, HW) instance rows: trivial reshape, no pad / de-pad passes ---
    x_rows = x_nchw.reshape(rows, HW)

    # Row tile: multiple of the sublane count, capped by the per-block VMEM
    # budget, and capped at ceil(rows/2) so the "parallel" axis has >= 2 steps
    # (v7x megacore) whenever rows allow.
    rt_cap = max(sub, (block_elems // max(HW, 1)) // sub * sub)
    rt_mc = max(sub, _round_up((rows + 1) // 2, sub))
    Rt = min(rt_cap, rt_mc, _round_up(rows, sub))

    compiler_kw = dict(vmem_limit_bytes=_VMEM_LIMIT_BYTES)
    use_chunked = force_chunked or (sub * HW > block_elems)

    if not use_chunked:
        kernel = functools.partial(_adain_resident_kernel, inv_hw=1.0 / HW)
        out_rows = pl.pallas_call(
            kernel,
            out_shape=jax.ShapeDtypeStruct((rows, HW), dtype),
            grid_spec=pltpu.PrefetchScalarGridSpec(
                num_scalar_prefetch=0,
                grid=(pl.cdiv(rows, Rt),),
                in_specs=[
                    pl.BlockSpec((Rt, 1), lambda r: (r, 0)),      # gamma
                    pl.BlockSpec((Rt, 1), lambda r: (r, 0)),      # beta
                    pl.BlockSpec((Rt, HW), lambda r: (r, 0)),     # x rows
                ],
                out_specs=pl.BlockSpec((Rt, HW), lambda r: (r, 0)),
            ),
            compiler_params=pltpu.CompilerParams(
                dimension_semantics=("parallel",), **compiler_kw),
        )(gamma, beta, x_rows)
    else:
        # Chunked-HW fallback (huge spatial extents): one extra read pass over
        # x, but blocks stay small and pipelinable instead of blowing VMEM.
        if hw_chunk is None:
            hw_chunk = max(128, (block_elems // sub) // 128 * 128)
        hw_chunk = min(hw_chunk, _round_up(HW, 128))
        rt_b = max(sub, min((block_elems // hw_chunk) // sub * sub,
                            rt_mc, _round_up(rows, sub)))
        kernel = functools.partial(_adain_chunked_kernel, hw=HW, hw_chunk=hw_chunk)
        out_rows = pl.pallas_call(
            kernel,
            out_shape=jax.ShapeDtypeStruct((rows, HW), dtype),
            grid_spec=pltpu.PrefetchScalarGridSpec(
                num_scalar_prefetch=0,
                grid=(pl.cdiv(rows, rt_b), 2, pl.cdiv(HW, hw_chunk)),
                in_specs=[
                    pl.BlockSpec((rt_b, 1), lambda r, p, h: (r, 0)),        # gamma
                    pl.BlockSpec((rt_b, 1), lambda r, p, h: (r, 0)),        # beta
                    pl.BlockSpec((rt_b, hw_chunk), lambda r, p, h: (r, h)), # x chunk
                ],
                # Pass 0 parks the output block at (r, 0) (never flushed while
                # resident); pass 1 streams the real output -> single output
                # write pass despite the two grid passes.
                out_specs=pl.BlockSpec((rt_b, hw_chunk), lambda r, p, h: (r, h * p)),
                scratch_shapes=[pltpu.VMEM((rt_b, 1), jnp.float32)] * 5,
            ),
            compiler_params=pltpu.CompilerParams(
                dimension_semantics=("parallel", "arbitrary", "arbitrary"),
                **compiler_kw),
        )(gamma, beta, x_rows)

    return out_rows.reshape(N, C, H, W)


# --------------------------------------------------------------------------
# Pure-JAX reference mirroring the PyTorch forward.
# --------------------------------------------------------------------------
def adain_reference(x_nchw, style, weight, bias):
    N, C, H, W = x_nchw.shape
    x = x_nchw.astype(jnp.float32).reshape(N, C, -1)
    aff = (style.astype(jnp.float32) @ weight.astype(jnp.float32).T
           + bias.astype(jnp.float32))
    gamma, beta = aff[:, :C], aff[:, C:]
    mean = x.mean(-1, keepdims=True)
    var = ((x - mean) ** 2).mean(-1, keepdims=True)
    x_hat = (x - mean) / jnp.sqrt(var + _EPS)
    out = gamma[:, :, None] * x_hat + beta[:, :, None]
    return out.reshape(N, C, H, W)


if __name__ == "__main__":
    key = jax.random.PRNGKey(0)
    kx, ks, kw, kx2, ks2 = jax.random.split(key, 5)
    STYLE_DIM = 32

    def make_params(c, k):
        w = 0.05 * jax.random.normal(k, (2 * c, STYLE_DIM), dtype=jnp.float32)
        # bias init exactly as in __init__: first fin entries = 1, rest = 0
        b = jnp.concatenate([jnp.ones((c,), jnp.float32), jnp.zeros((c,), jnp.float32)])
        return w, b

    # ---- test 1: resident path, f32, batch=2, channels=4, 16x16 spatial ----
    N, C, H, W = 2, 4, 16, 16
    weight, bias = make_params(C, kw)
    x = jax.random.normal(kx, (N, C, H, W), dtype=jnp.float32)
    style = jax.random.normal(ks, (N, STYLE_DIM), dtype=jnp.float32)
    out = jax.block_until_ready(adaptive_instance_norm(x, style, weight, bias))
    ref = adain_reference(x, style, weight, bias)
    assert out.shape == (N, C, H, W)
    assert jnp.allclose(out, ref, atol=1e-4, rtol=1e-4), "mismatch (resident f32)"

    # ---- test 2: resident path, bf16, odd shapes (partial row tile, HW%128!=0) ----
    N2, C2, H2, W2 = 2, 5, 9, 11
    weight2, bias2 = make_params(C2, kw)
    x2 = jax.random.normal(kx2, (N2, C2, H2, W2), dtype=jnp.float32).astype(jnp.bfloat16)
    style2 = jax.random.normal(ks2, (N2, STYLE_DIM), dtype=jnp.float32)
    out2 = jax.block_until_ready(adaptive_instance_norm(x2, style2, weight2, bias2))
    ref2 = adain_reference(x2, style2, weight2, bias2)
    assert out2.dtype == jnp.bfloat16
    assert jnp.allclose(out2.astype(jnp.float32), ref2, atol=1.5e-1, rtol=1e-1), \
        "mismatch (resident bf16)"

    # ---- test 3: chunked-HW fallback (forced), partial last lane chunk ----
    N3, C3, H3, W3 = 2, 4, 10, 13            # HW = 130 -> one full + one partial chunk
    weight3, bias3 = make_params(C3, kw)
    x3 = jax.random.normal(kx, (N3, C3, H3, W3), dtype=jnp.float32)
    style3 = jax.random.normal(ks, (N3, STYLE_DIM), dtype=jnp.float32)
    out3 = jax.block_until_ready(
        adaptive_instance_norm(x3, style3, weight3, bias3,
                               force_chunked=True, hw_chunk=128))
    ref3 = adain_reference(x3, style3, weight3, bias3)
    assert jnp.allclose(out3, ref3, atol=1e-4, rtol=1e-4), "mismatch (chunked f32)"

    print("KERNEL_OK")
</pallas_src>

<mosaic_0001>
module attributes {stable_mosaic.version = 11 : i64} {
  func.func @_adain_resident_kernel(%arg0: i32, %arg1: memref<8x1xf32, #tpu.memory_space<vmem>>, %arg2: memref<8x1xf32, #tpu.memory_space<vmem>>, %arg3: memref<8x256xf32, #tpu.memory_space<vmem>>, %arg4: memref<8x256xf32, #tpu.memory_space<vmem>>) attributes {dimension_semantics = [#tpu.dimension_semantics<parallel>], iteration_bounds = array<i64: 1>, scalar_prefetch = 0 : i64, scratch_operands = 0 : i64, tpu.core_type = #tpu.core_type<tc>, window_params = [{transform_indices = @transform_0, window_bounds = array<i64: 8, 1>}, {transform_indices = @transform_1, window_bounds = array<i64: 8, 1>}, {transform_indices = @transform_2, window_bounds = array<i64: 8, 256>}, {transform_indices = @transform_3, window_bounds = array<i64: 8, 256>}]} {
    %c0 = arith.constant 0 : index
    %c0_0 = arith.constant 0 : index
    %0 = vector.load %arg3[%c0, %c0_0] : memref<8x256xf32, #tpu.memory_space<vmem>>, vector<8x256xf32>
    %cst = arith.constant dense<0.000000e+00> : vector<8xf32>
    %1 = vector.multi_reduction <add>, %0, %cst [1] : vector<8x256xf32> to vector<8xf32>
    %2 = vector.shape_cast %1 : vector<8xf32> to vector<8x1xf32>
    %cst_1 = arith.constant 3.906250e-03 : f32
    %3 = vector.broadcast %cst_1 : f32 to vector<8x1xf32>
    %4 = arith.mulf %2, %3 : vector<8x1xf32>
    %5 = vector.broadcast %4 : vector<8x1xf32> to vector<8x256xf32>
    %6 = arith.subf %0, %5 : vector<8x256xf32>
    %7 = arith.mulf %6, %6 : vector<8x256xf32>
    %cst_2 = arith.constant dense<0.000000e+00> : vector<8xf32>
    %8 = vector.multi_reduction <add>, %7, %cst_2 [1] : vector<8x256xf32> to vector<8xf32>
    %9 = vector.shape_cast %8 : vector<8xf32> to vector<8x1xf32>
    %cst_3 = arith.constant 3.906250e-03 : f32
    %10 = vector.broadcast %cst_3 : f32 to vector<8x1xf32>
    %11 = arith.mulf %9, %10 : vector<8x1xf32>
    %cst_4 = arith.constant 9.99999974E-6 : f32
    %12 = vector.broadcast %cst_4 : f32 to vector<8x1xf32>
    %13 = arith.addf %11, %12 : vector<8x1xf32>
    %14 = math.rsqrt %13 : vector<8x1xf32>
    %c0_5 = arith.constant 0 : index
    %c0_6 = arith.constant 0 : index
    %15 = vector.load %arg1[%c0_5, %c0_6] : memref<8x1xf32, #tpu.memory_space<vmem>>, vector<8x1xf32>
    %16 = arith.mulf %15, %14 : vector<8x1xf32>
    %17 = vector.broadcast %16 : vector<8x1xf32> to vector<8x256xf32>
    %18 = arith.mulf %6, %17 : vector<8x256xf32>
    %c0_7 = arith.constant 0 : index
    %c0_8 = arith.constant 0 : index
    %19 = vector.load %arg2[%c0_7, %c0_8] : memref<8x1xf32, #tpu.memory_space<vmem>>, vector<8x1xf32>
    %20 = vector.broadcast %19 : vector<8x1xf32> to vector<8x256xf32>
    %21 = arith.addf %18, %20 : vector<8x256xf32>
    %c0_9 = arith.constant 0 : index
    %c0_10 = arith.constant 0 : index
    %22 = vector.load %arg4[%c0_9, %c0_10] : memref<8x256xf32, #tpu.memory_space<vmem>>, vector<8x256xf32>
    tpu.vector_store %arg4[%c0_9, %c0_10], %21 {strides = array<i32>} : memref<8x256xf32, #tpu.memory_space<vmem>>, vector<8x256xf32>,
    return
  }
  func.func @transform_0(%arg0: i32) -> (i32, i32) {
    %c0_i32 = arith.constant 0 : i32
    %c0_i32_0 = arith.constant 0 : i32
    return %arg0, %c0_i32 : i32, i32
  }
  func.func @transform_1(%arg0: i32) -> (i32, i32) {
    %c0_i32 = arith.constant 0 : i32
    %c0_i32_0 = arith.constant 0 : i32
    return %arg0, %c0_i32 : i32, i32
  }
  func.func @transform_2(%arg0: i32) -> (i32, i32) {
    %c0_i32 = arith.constant 0 : i32
    %c0_i32_0 = arith.constant 0 : i32
    return %arg0, %c0_i32 : i32, i32
  }
  func.func @transform_3(%arg0: i32) -> (i32, i32) {
    %c0_i32 = arith.constant 0 : i32
    %c0_i32_0 = arith.constant 0 : i32
    return %arg0, %c0_i32 : i32, i32
  }
}

</mosaic_0001>

<bundles_post_ra>
// kernel: tpu_custom_call.1
= control target key start
LH: loop header
LB: loop body
LE: loop exit
PB: predicated region body
PF: predicated region fallthrough
CT: control target
= control target key end

     0   :  { %s140_s0 = inlined_call_operand.vmem [shape: f32[8,1], index: 0, kind: input, shape index: {}]   ;;  %s141_s1 = inlined_call_operand.vmem [shape: f32[8,1], index: 1, kind: input, shape index: {}]   ;;  %s142_s2 = inlined_call_operand.vmem [shape: f32[8,256], index: 2, kind: input, shape index: {}]   ;;  %s143_s3 = inlined_call_operand.hbm [shape: f32[8,256], index: 3, kind: output, shape index: {}]  }
   0x1   :  { %v15_v0 = vld [vmem:[%s142_s2] sm:$0xff]  ;;  %v16_v1 = vld [vmem:[%s142_s2 + $0x8] sm:$0xff] }
   0x2   :  { %8 = vsyncpa [#allocation3], 0  ;;  %v17_v2 = vadd.f32 %v16_v1, %v15_v0  ;;  %v94_v10 = vmov 0   ;;  %v31_v14 = vld [vmem:[%s140_s0] sm:$0xff]  ;;  %s95_s19 = smov [#allocation2]  }
   0x3   :  { %66 = vset.pattern.permute.xlu1 %v94_v10  ;;  %67 = vset.pattern.permute.xlu0 %v94_v10  ;;  %v40_v17 = vld [vmem:[%s141_s1] sm:$0xff]  ;;  %s56_s20 = sshll.u32 %s95_s19, 4  ;;  %s57_s20 = int_to_ptr.vmem [resolvable:$true] %s56_s20 }
   0x4   :  { %18 = vadd.xlane.f32.xlu0 %v17_v2  ;;  %s70_s0 = scalar_lea.vmem %s57_s20, 256  ;;  %p75_p1 = scmp.lt.s32.totalorder %s57_s20, %s57_s20 }
   0x5   :  { %p71_p0 = scmp.ne.s32.totalorder %s57_s20, %s70_s0  ;;  %p76_p2 = scmp.lt.s32.totalorder %s70_s0, %s70_s0 }
   0x7   :  { %p77_p3 = por %p76_p2, %p75_p1 }
   0x9   :  { %p78_p4 = pnand %p77_p3, %p71_p0 }
  0x91   :  { %v19_v3 = vpop.xlane.xlu0 %18 }
  0x92   :  { %v20_v4 = vmul.f32 0.00390625, %v19_v3 }
  0x94   :  { %v21_v5 = vsub.f32 %v15_v0, %v20_v4  ;;  %v22_v6 = vsub.f32 %v16_v1, %v20_v4 }
  0x96   :  { %v23_v7 = vmul.f32 %v21_v5, %v21_v5  ;;  %v24_v8 = vmul.f32 %v22_v6, %v22_v6 }
  0x98   :  { %v25_v9 = vadd.f32 %v24_v8, %v23_v7 }
  0x9a   :  { %26 = vadd.xlane.f32.xlu0 %v25_v9 }
 0x127   :  { %v27_v11 = vpop.xlane.xlu0 %26 }
 0x128   :  { %v28_v12 = vmul.f32 0.00390625, %v27_v11 }
 0x12a   :  { %v29_v13 = vadd.f32 1e-05, %v28_v12 }
 0x12c   :  { %68 = vrsqrt.f32 %v29_v13 }
 0x136   :  { %v69_v15 = vpop.eup %68 }
 0x137   :  { %v32_v16 = vmul.f32 %v69_v15, %v31_v14 }
 0x139   :  { %35 = vperm.xlu1 %66, %v32_v16  }
 0x13d   :  { %43 = vperm.xlu1 %66, %v40_v17  }
 0x1b8   :  { %v36_v18 = vpop.permute.xlu1 %35 }
 0x1b9   :  { %v38_v19 = vmul.f32 %v36_v18, %v21_v5  ;;  %v39_v20 = vmul.f32 %v36_v18, %v22_v6 }
 0x1bc   :  { %v44_v21 = vpop.permute.xlu1 %43 }
 0x1bd   :  { %v46_v22 = vadd.f32 %v44_v21, %v38_v19  ;;  %v47_v23 = vadd.f32 %v44_v21, %v39_v20 }
 0x1bf   :  { %48 = vst [vmem:[#allocation2] sm:$0xff] %v46_v22  ;;  %49 = vst [vmem:[#allocation2 + $0x8] sm:$0xff] %v47_v23 }
 0x1c0   :  { %81 = shalt.err (!%p78_p4)
}
 0x1c1   :  { %s82_s22 = scalar_lea.hbm %s143_s3, 256 }
 0x1c2   :  { %p83_p5 = scmp.ne.s32.totalorder %s143_s3, %s82_s22  ;;  %p86_p6 = scmp.lt.u32.totalorder %s82_s22, %s143_s3 }
 0x1c4   :  { %p88_p7 = pnand %p86_p6, %p83_p5 }
 0x1c6   :  { %91 = shalt.err (!%p88_p7)
}
 0x1c7   :  { %59 = dma.vmem_to_hbm [thread:$0]  %s57_s20, 256, %s143_s3, [#allocation3]  }
 0x1c8   :  { %92 = dma.done.wait [#allocation3], 256  }
 0x1c9   :  { %93 = vsyncadd [#allocation3], 4294967040 }
 0x1ca   :  { %63 = vsyncpa [#allocation3], 1 }

</bundles_post_ra>
